<compile_context>
chip_gen: v5e
topology: v5e:2x2
jax: 0.10.0
libtpu: 0.0.40
codegen_flags: <defaults>
</compile_context>

<pallas_src>
from functools import partial

import jax
import jax.numpy as jnp
from jax.experimental import pallas as pl
from jax.experimental.pallas import tpu as pltpu


def _sigmoid(x):
    # sigmoid(x) == 0.5 * (1 + tanh(x / 2)); tanh rides the EUP slot.
    return 0.5 * (jnp.tanh(0.5 * x) + 1.0)


def cnn_lstm_kernel(x_ref,
                    w1_ref, sh1_ref,
                    w2_ref, sh2_ref,
                    w3_ref, sh3_ref,
                    wih_ref, whh_ref, bl_ref,
                    wfc_ref, bfc_ref,
                    out_ref):
    n_pad = out_ref.shape[0]            # padded batch = one f32 sublane group
    hdim = whh_ref.shape[0]

    def conv_layer(x2d, w_ref, sh_ref):
        """Conv1d(k=3, s=2, p=1) + folded BN + ReLU on a t-major f32 slab.

        x2d : (L*Np, Cin) f32, row index = t*Np + n (L even).
        w   : (3, Cin, Cout) bf16 tap weights (BN scale folded in).
        sh  : (1, Cout) f32 folded conv-bias + BN shift.
        Returns (Lo*Np, Cout) f32, t-major, Lo = L // 2.
        """
        rows, cin = x2d.shape
        lo = (rows // n_pad) // 2
        # Even / odd timestep slabs from unit-stride, 8-row-aligned slices
        # (pure vreg selection; replaces the old quadratic 0/1 gather matmuls).
        even = jnp.concatenate(
            [x2d[(2 * t) * n_pad:(2 * t + 1) * n_pad] for t in range(lo)], axis=0)
        odd = jnp.concatenate(
            [x2d[(2 * t + 1) * n_pad:(2 * t + 2) * n_pad] for t in range(lo)], axis=0)
        zrow = jnp.zeros((n_pad, cin), jnp.float32)
        if lo > 1:                                      # tap 0 reads x[2o-1]
            prev = jnp.concatenate([zrow, odd[:(lo - 1) * n_pad]], axis=0)
        else:
            prev = zrow
        # Three accumulated tap matmuls; bf16 only at the MXU inputs.
        y = (jnp.dot(prev.astype(jnp.bfloat16), w_ref[0],
                     preferred_element_type=jnp.float32)
             + jnp.dot(even.astype(jnp.bfloat16), w_ref[1],
                       preferred_element_type=jnp.float32)
             + jnp.dot(odd.astype(jnp.bfloat16), w_ref[2],
                       preferred_element_type=jnp.float32)
             + sh_ref[...])
        return jnp.maximum(y, 0.0)

    h1 = conv_layer(x_ref[...], w1_ref, sh1_ref)        # (8*Np, k)
    h2 = conv_layer(h1, w2_ref, sh2_ref)                # (4*Np, 2k)
    h3 = conv_layer(h2, w3_ref, sh3_ref)                # (2*Np, 4k), t-major

    t_len = h3.shape[0] // n_pad

    # Hoisted LSTM input projection (single matmul for all timesteps).
    zx = (jnp.dot(h3.astype(jnp.bfloat16), wih_ref[...],
                  preferred_element_type=jnp.float32) + bl_ref[...])   # (T*Np, 4H)
    whh = whh_ref[...]                                                 # (H, 4H) bf16

    def gates(z):
        zs = _sigmoid(z)                 # one full-width EUP pass covers i/f/o
        return (zs[:, 0:hdim], zs[:, hdim:2 * hdim],
                jnp.tanh(z[:, 2 * hdim:3 * hdim]), zs[:, 3 * hdim:4 * hdim])

    # t = 0 (h_prev = c_prev = 0).
    i_g, _, g_g, o_g = gates(zx[0:n_pad])
    c = i_g * g_g
    h = o_g * jnp.tanh(c)
    hmax = h
    # Static unroll over the (tiny, static) sequence length.
    for t in range(1, t_len):
        z = zx[t * n_pad:(t + 1) * n_pad] + jnp.dot(
            h.astype(jnp.bfloat16), whh, preferred_element_type=jnp.float32)
        i_g, f_g, g_g, o_g = gates(z)
        c = f_g * c + i_g * g_g
        h = o_g * jnp.tanh(c)
        hmax = jnp.maximum(hmax, h)

    # Single lane-dense (Np, 128) store; real logits are columns [:out_size].
    out_ref[...] = (jnp.dot(hmax.astype(jnp.bfloat16), wfc_ref[...],
                            preferred_element_type=jnp.float32) + bfc_ref[...])


def prepare_params(params):
    """One-time host-side prep: fold conv bias + eval-mode BN into per-tap
    scaled weights and a single shift, cast MXU weight operands to bf16, and
    zero-pad the FC to a lane-dense 128-wide output."""
    kp = {}
    for li in (1, 2, 3):
        w = params[f"w{li}"]                      # (3, Cin, Cout) f32
        s = params[f"s{li}"]                      # (1, Cout)
        kp[f"w{li}"] = (w * s).astype(jnp.bfloat16)
        kp[f"sh{li}"] = params[f"b{li}"] * s + params[f"sh{li}"]   # (1, Cout) f32
    kp["wih"] = params["wih"].astype(jnp.bfloat16)                 # (4k, 4H)
    kp["whh"] = params["whh"].astype(jnp.bfloat16)                 # (H, 4H)
    kp["bl"] = params["bl"]                                        # (1, 4H) f32
    hidden, out_size = params["wfc"].shape
    wfc = jnp.zeros((hidden, 128), jnp.float32).at[:, :out_size].set(params["wfc"])
    bfc = jnp.zeros((1, 128), jnp.float32).at[:, :out_size].set(params["bfc"])
    kp["wfc"] = wfc.astype(jnp.bfloat16)
    kp["bfc"] = bfc
    return kp


@partial(jax.jit, static_argnames=("out_size",))
def cnn_lstm_forward(x_ncl, kp, *, out_size):
    n, n_ch, l_in = x_ncl.shape
    assert l_in % 2 == 0, "conv chain assumes even lengths (e.g. 16 -> 8 -> 4 -> 2)"
    n_pad = max(8, ((n + 7) // 8) * 8)            # batch padded to sublane multiple

    # NCL -> t-major (L, Np, C) -> flattened (L*Np, C) f32 slab (glue only).
    x = jnp.transpose(x_ncl, (2, 0, 1)).astype(jnp.float32)
    x = jnp.pad(x, ((0, 0), (0, n_pad - n), (0, 0)))
    x2d = x.reshape(l_in * n_pad, n_ch)

    args = (x2d,
            kp["w1"], kp["sh1"], kp["w2"], kp["sh2"], kp["w3"], kp["sh3"],
            kp["wih"], kp["whh"], kp["bl"], kp["wfc"], kp["bfc"])

    # Advisory cost estimate (helps XLA schedule around the call).
    hidden = kp["whh"].shape[0]
    flops = 0
    l, cin = l_in, n_ch
    for li in (1, 2, 3):
        cout = kp[f"w{li}"].shape[2]
        l = l // 2
        flops += 3 * 2 * (l * n_pad) * cin * cout
        cin = cout
    t_len = l
    flops += 2 * (t_len * n_pad) * cin * 4 * hidden          # zx = h3 @ Wih
    flops += (t_len - 1) * 2 * n_pad * hidden * 4 * hidden   # h @ Whh recurrence
    flops += 2 * n_pad * hidden * 128                        # padded FC
    trans = t_len * n_pad * 6 * hidden
    nbytes = sum(int(a.size) * a.dtype.itemsize for a in args) + n_pad * 128 * 4

    out_pad = pl.pallas_call(
        cnn_lstm_kernel,
        out_shape=jax.ShapeDtypeStruct((n_pad, 128), jnp.float32),
        in_specs=[pl.BlockSpec(memory_space=pltpu.MemorySpace.VMEM) for _ in args],
        out_specs=pl.BlockSpec(memory_space=pltpu.MemorySpace.VMEM),
        compiler_params=pltpu.CompilerParams(vmem_limit_bytes=32 * 1024 * 1024),
        cost_estimate=pl.CostEstimate(flops=flops, transcendentals=trans,
                                      bytes_accessed=nbytes),
    )(*args)
    return out_pad[:n, :out_size]


def init_params(key, n_ch=4, n_filters=8, hidden=16, out_size=5):
    """Deterministic synthetic parameters (PyTorch-style uniform fan-in init)."""
    k = n_filters
    eps = 1e-5

    def uniform(kk, shape, bound):
        return jax.random.uniform(kk, shape, jnp.float32, -bound, bound)

    keys = jax.random.split(key, 12)
    p = {}
    chans = [(n_ch, k), (k, 2 * k), (2 * k, 4 * k)]
    for li, (cin, cout) in enumerate(chans, start=1):
        bound = 1.0 / (cin * 3) ** 0.5
        w = uniform(keys[2 * (li - 1)], (cout, cin, 3), bound)    # PyTorch (Cout,Cin,K)
        b = uniform(keys[2 * (li - 1) + 1], (cout,), bound)
        p[f"w{li}"] = jnp.transpose(w, (2, 1, 0))                 # (3, Cin, Cout)
        p[f"b{li}"] = b.reshape(1, cout)
        # BatchNorm1d eval-mode: gamma=1, beta=0, running_mean=0, running_var=1
        gamma = jnp.ones((cout,), jnp.float32)
        beta = jnp.zeros((cout,), jnp.float32)
        rmean = jnp.zeros((cout,), jnp.float32)
        rvar = jnp.ones((cout,), jnp.float32)
        scale = gamma / jnp.sqrt(rvar + eps)
        p[f"s{li}"] = scale.reshape(1, cout)
        p[f"sh{li}"] = (beta - rmean * scale).reshape(1, cout)

    bound = 1.0 / hidden ** 0.5
    w_ih = uniform(keys[6], (4 * hidden, 4 * k), bound)           # PyTorch layout
    w_hh = uniform(keys[7], (4 * hidden, hidden), bound)
    b_ih = uniform(keys[8], (4 * hidden,), bound)
    b_hh = uniform(keys[9], (4 * hidden,), bound)
    p["wih"] = w_ih.T                                             # (4k, 4H)
    p["whh"] = w_hh.T                                             # (H, 4H)
    p["bl"] = (b_ih + b_hh).reshape(1, 4 * hidden)

    w_fc = uniform(keys[10], (out_size, hidden), bound)
    b_fc = uniform(keys[11], (out_size,), bound)
    p["wfc"] = w_fc.T                                             # (H, out_size)
    p["bfc"] = b_fc.reshape(1, out_size)
    return p


def reference_forward(x_ncl, params):
    """Pure-JAX f32 reference of the PyTorch forward (eval-mode BN)."""
    x = jnp.transpose(x_ncl, (0, 2, 1)).astype(jnp.float32)       # (N, L, C)

    def conv(xx, w, b, s, sh):
        _, L, _ = xx.shape
        l_out = (L - 1) // 2 + 1
        xp = jnp.pad(xx, ((0, 0), (1, 1), (0, 0)))
        y = jnp.zeros((xx.shape[0], l_out, w.shape[-1]), jnp.float32)
        for j in range(3):
            y = y + jnp.einsum("nlc,cd->nld",
                               xp[:, j:j + 2 * l_out - 1:2, :], w[j])
        return jnp.maximum((y + b) * s + sh, 0.0)

    h = conv(x, params["w1"], params["b1"], params["s1"], params["sh1"])
    h = conv(h, params["w2"], params["b2"], params["s2"], params["sh2"])
    h = conv(h, params["w3"], params["b3"], params["s3"], params["sh3"])

    H = params["whh"].shape[0]
    N, T, _ = h.shape
    hs = jnp.zeros((N, H), jnp.float32)
    cs = jnp.zeros((N, H), jnp.float32)
    hmax = jnp.full((N, H), -jnp.inf, jnp.float32)
    for t in range(T):
        z = h[:, t, :] @ params["wih"] + hs @ params["whh"] + params["bl"]
        i = jax.nn.sigmoid(z[:, :H])
        f = jax.nn.sigmoid(z[:, H:2 * H])
        g = jnp.tanh(z[:, 2 * H:3 * H])
        o = jax.nn.sigmoid(z[:, 3 * H:])
        cs = f * cs + i * g
        hs = o * jnp.tanh(cs)
        hmax = jnp.maximum(hmax, hs)
    return hmax @ params["wfc"] + params["bfc"]


if __name__ == "__main__":
    key = jax.random.PRNGKey(0)
    key_x, key_p = jax.random.split(key)
    N, n_ch, L = 2, 4, 16                       # L: 16 -> 8 -> 4 -> 2 (LSTM seq len 2)
    x = jax.random.normal(key_x, (N, n_ch, L), jnp.float32)       # PyTorch NCL layout
    params = init_params(key_p, n_ch=n_ch, n_filters=8, hidden=16, out_size=5)
    kparams = prepare_params(params)            # fold / cast / pad once per shape

    out = jax.block_until_ready(cnn_lstm_forward(x, kparams, out_size=5))
    ref = reference_forward(x, params)

    assert out.shape == (N, 5), out.shape
    # bf16 MXU inputs (f32 accumulation) vs pure-f32 reference -> loosened tol.
    assert jnp.allclose(out, ref, rtol=2e-2, atol=2e-2), (out, ref)
    print("KERNEL_OK")
</pallas_src>

<mosaic_0001>
module attributes {stable_mosaic.version = 11 : i64} {
  func.func @cnn_lstm_kernel(%arg0: memref<128x4xf32, #tpu.memory_space<vmem>>, %arg1: memref<3x4x8xbf16, #tpu.memory_space<vmem>>, %arg2: memref<1x8xf32, #tpu.memory_space<vmem>>, %arg3: memref<3x8x16xbf16, #tpu.memory_space<vmem>>, %arg4: memref<1x16xf32, #tpu.memory_space<vmem>>, %arg5: memref<3x16x32xbf16, #tpu.memory_space<vmem>>, %arg6: memref<1x32xf32, #tpu.memory_space<vmem>>, %arg7: memref<32x64xbf16, #tpu.memory_space<vmem>>, %arg8: memref<16x64xbf16, #tpu.memory_space<vmem>>, %arg9: memref<1x64xf32, #tpu.memory_space<vmem>>, %arg10: memref<16x128xbf16, #tpu.memory_space<vmem>>, %arg11: memref<1x128xf32, #tpu.memory_space<vmem>>, %arg12: memref<8x128xf32, #tpu.memory_space<vmem>>) attributes {dimension_semantics = [], scalar_prefetch = 0 : i64, scratch_operands = 0 : i64, tpu.core_type = #tpu.core_type<tc>} {
    %c0 = arith.constant 0 : index
    %c0_0 = arith.constant 0 : index
    %0 = vector.load %arg0[%c0, %c0_0] : memref<128x4xf32, #tpu.memory_space<vmem>>, vector<128x4xf32>
    %1 = vector.extract_strided_slice %0 {offsets = [0, 0], sizes = [8, 4], strides = [1, 1]} : vector<128x4xf32> to vector<8x4xf32>
    %2 = vector.extract_strided_slice %0 {offsets = [16, 0], sizes = [8, 4], strides = [1, 1]} : vector<128x4xf32> to vector<8x4xf32>
    %3 = vector.extract_strided_slice %0 {offsets = [32, 0], sizes = [8, 4], strides = [1, 1]} : vector<128x4xf32> to vector<8x4xf32>
    %4 = vector.extract_strided_slice %0 {offsets = [48, 0], sizes = [8, 4], strides = [1, 1]} : vector<128x4xf32> to vector<8x4xf32>
    %5 = vector.extract_strided_slice %0 {offsets = [64, 0], sizes = [8, 4], strides = [1, 1]} : vector<128x4xf32> to vector<8x4xf32>
    %6 = vector.extract_strided_slice %0 {offsets = [80, 0], sizes = [8, 4], strides = [1, 1]} : vector<128x4xf32> to vector<8x4xf32>
    %7 = vector.extract_strided_slice %0 {offsets = [96, 0], sizes = [8, 4], strides = [1, 1]} : vector<128x4xf32> to vector<8x4xf32>
    %8 = vector.extract_strided_slice %0 {offsets = [112, 0], sizes = [8, 4], strides = [1, 1]} : vector<128x4xf32> to vector<8x4xf32>
    %9 = tpu.concatenate %1, %2, %3, %4, %5, %6, %7, %8 in 0 : vector<8x4xf32>, vector<8x4xf32>, vector<8x4xf32>, vector<8x4xf32>, vector<8x4xf32>, vector<8x4xf32>, vector<8x4xf32>, vector<8x4xf32> -> vector<64x4xf32>
    %10 = vector.extract_strided_slice %0 {offsets = [8, 0], sizes = [8, 4], strides = [1, 1]} : vector<128x4xf32> to vector<8x4xf32>
    %11 = vector.extract_strided_slice %0 {offsets = [24, 0], sizes = [8, 4], strides = [1, 1]} : vector<128x4xf32> to vector<8x4xf32>
    %12 = vector.extract_strided_slice %0 {offsets = [40, 0], sizes = [8, 4], strides = [1, 1]} : vector<128x4xf32> to vector<8x4xf32>
    %13 = vector.extract_strided_slice %0 {offsets = [56, 0], sizes = [8, 4], strides = [1, 1]} : vector<128x4xf32> to vector<8x4xf32>
    %14 = vector.extract_strided_slice %0 {offsets = [72, 0], sizes = [8, 4], strides = [1, 1]} : vector<128x4xf32> to vector<8x4xf32>
    %15 = vector.extract_strided_slice %0 {offsets = [88, 0], sizes = [8, 4], strides = [1, 1]} : vector<128x4xf32> to vector<8x4xf32>
    %16 = vector.extract_strided_slice %0 {offsets = [104, 0], sizes = [8, 4], strides = [1, 1]} : vector<128x4xf32> to vector<8x4xf32>
    %17 = vector.extract_strided_slice %0 {offsets = [120, 0], sizes = [8, 4], strides = [1, 1]} : vector<128x4xf32> to vector<8x4xf32>
    %18 = tpu.concatenate %10, %11, %12, %13, %14, %15, %16, %17 in 0 : vector<8x4xf32>, vector<8x4xf32>, vector<8x4xf32>, vector<8x4xf32>, vector<8x4xf32>, vector<8x4xf32>, vector<8x4xf32>, vector<8x4xf32> -> vector<64x4xf32>
    %cst = arith.constant 0.000000e+00 : f32
    %19 = vector.broadcast %cst : f32 to vector<8x4xf32>
    %20 = vector.extract_strided_slice %18 {offsets = [0, 0], sizes = [56, 4], strides = [1, 1]} : vector<64x4xf32> to vector<56x4xf32>
    %21 = tpu.concatenate %19, %20 in 0 : vector<8x4xf32>, vector<56x4xf32> -> vector<64x4xf32>
    %22 = arith.truncf %21 : vector<64x4xf32> to vector<64x4xbf16>
    %c0_1 = arith.constant 0 : index
    %c0_2 = arith.constant 0 : index
    %c0_3 = arith.constant 0 : index
    %23 = vector.load %arg1[%c0_1, %c0_2, %c0_3] : memref<3x4x8xbf16, #tpu.memory_space<vmem>>, vector<1x4x8xbf16>
    %24 = vector.shape_cast %23 : vector<1x4x8xbf16> to vector<4x8xbf16>
    %cst_4 = arith.constant dense<0.000000e+00> : vector<64x8xf32>
    %25 = tpu.matmul %22, %24, %cst_4 {dimension_numbers = #tpu.dot_dimension_numbers<[1], [0], [0], [1], [0, 0, 1, 1], [], []>} : vector<64x4xbf16>, vector<4x8xbf16>, vector<64x8xf32> -> vector<64x8xf32>
    %26 = arith.truncf %9 : vector<64x4xf32> to vector<64x4xbf16>
    %c1 = arith.constant 1 : index
    %c0_5 = arith.constant 0 : index
    %c0_6 = arith.constant 0 : index
    %27 = vector.load %arg1[%c1, %c0_5, %c0_6] : memref<3x4x8xbf16, #tpu.memory_space<vmem>>, vector<1x4x8xbf16>
    %28 = vector.shape_cast %27 : vector<1x4x8xbf16> to vector<4x8xbf16>
    %cst_7 = arith.constant dense<0.000000e+00> : vector<64x8xf32>
    %29 = tpu.matmul %26, %28, %cst_7 {dimension_numbers = #tpu.dot_dimension_numbers<[1], [0], [0], [1], [0, 0, 1, 1], [], []>} : vector<64x4xbf16>, vector<4x8xbf16>, vector<64x8xf32> -> vector<64x8xf32>
    %30 = arith.addf %25, %29 : vector<64x8xf32>
    %31 = arith.truncf %18 : vector<64x4xf32> to vector<64x4xbf16>
    %c2 = arith.constant 2 : index
    %c0_8 = arith.constant 0 : index
    %c0_9 = arith.constant 0 : index
    %32 = vector.load %arg1[%c2, %c0_8, %c0_9] : memref<3x4x8xbf16, #tpu.memory_space<vmem>>, vector<1x4x8xbf16>
    %33 = vector.shape_cast %32 : vector<1x4x8xbf16> to vector<4x8xbf16>
    %cst_10 = arith.constant dense<0.000000e+00> : vector<64x8xf32>
    %34 = tpu.matmul %31, %33, %cst_10 {dimension_numbers = #tpu.dot_dimension_numbers<[1], [0], [0], [1], [0, 0, 1, 1], [], []>} : vector<64x4xbf16>, vector<4x8xbf16>, vector<64x8xf32> -> vector<64x8xf32>
    %35 = arith.addf %30, %34 : vector<64x8xf32>
    %c0_11 = arith.constant 0 : index
    %c0_12 = arith.constant 0 : index
    %36 = vector.load %arg2[%c0_11, %c0_12] : memref<1x8xf32, #tpu.memory_space<vmem>>, vector<1x8xf32>
    %37 = vector.broadcast %36 : vector<1x8xf32> to vector<64x8xf32>
    %38 = arith.addf %35, %37 : vector<64x8xf32>
    %cst_13 = arith.constant 0.000000e+00 : f32
    %39 = vector.broadcast %cst_13 : f32 to vector<64x8xf32>
    %40 = arith.maximumf %38, %39 : vector<64x8xf32>
    %41 = vector.extract_strided_slice %40 {offsets = [0, 0], sizes = [8, 8], strides = [1, 1]} : vector<64x8xf32> to vector<8x8xf32>
    %42 = vector.extract_strided_slice %40 {offsets = [16, 0], sizes = [8, 8], strides = [1, 1]} : vector<64x8xf32> to vector<8x8xf32>
    %43 = vector.extract_strided_slice %40 {offsets = [32, 0], sizes = [8, 8], strides = [1, 1]} : vector<64x8xf32> to vector<8x8xf32>
    %44 = vector.extract_strided_slice %40 {offsets = [48, 0], sizes = [8, 8], strides = [1, 1]} : vector<64x8xf32> to vector<8x8xf32>
    %45 = tpu.concatenate %41, %42, %43, %44 in 0 : vector<8x8xf32>, vector<8x8xf32>, vector<8x8xf32>, vector<8x8xf32> -> vector<32x8xf32>
    %46 = vector.extract_strided_slice %40 {offsets = [8, 0], sizes = [8, 8], strides = [1, 1]} : vector<64x8xf32> to vector<8x8xf32>
    %47 = vector.extract_strided_slice %40 {offsets = [24, 0], sizes = [8, 8], strides = [1, 1]} : vector<64x8xf32> to vector<8x8xf32>
    %48 = vector.extract_strided_slice %40 {offsets = [40, 0], sizes = [8, 8], strides = [1, 1]} : vector<64x8xf32> to vector<8x8xf32>
    %49 = vector.extract_strided_slice %40 {offsets = [56, 0], sizes = [8, 8], strides = [1, 1]} : vector<64x8xf32> to vector<8x8xf32>
    %50 = tpu.concatenate %46, %47, %48, %49 in 0 : vector<8x8xf32>, vector<8x8xf32>, vector<8x8xf32>, vector<8x8xf32> -> vector<32x8xf32>
    %cst_14 = arith.constant 0.000000e+00 : f32
    %51 = vector.broadcast %cst_14 : f32 to vector<8x8xf32>
    %52 = vector.extract_strided_slice %50 {offsets = [0, 0], sizes = [24, 8], strides = [1, 1]} : vector<32x8xf32> to vector<24x8xf32>
    %53 = tpu.concatenate %51, %52 in 0 : vector<8x8xf32>, vector<24x8xf32> -> vector<32x8xf32>
    %54 = arith.truncf %53 : vector<32x8xf32> to vector<32x8xbf16>
    %c0_15 = arith.constant 0 : index
    %c0_16 = arith.constant 0 : index
    %c0_17 = arith.constant 0 : index
    %55 = vector.load %arg3[%c0_15, %c0_16, %c0_17] : memref<3x8x16xbf16, #tpu.memory_space<vmem>>, vector<1x8x16xbf16>
    %56 = vector.shape_cast %55 : vector<1x8x16xbf16> to vector<8x16xbf16>
    %cst_18 = arith.constant dense<0.000000e+00> : vector<32x16xf32>
    %57 = tpu.matmul %54, %56, %cst_18 {dimension_numbers = #tpu.dot_dimension_numbers<[1], [0], [0], [1], [0, 0, 1, 1], [], []>} : vector<32x8xbf16>, vector<8x16xbf16>, vector<32x16xf32> -> vector<32x16xf32>
    %58 = arith.truncf %45 : vector<32x8xf32> to vector<32x8xbf16>
    %c1_19 = arith.constant 1 : index
    %c0_20 = arith.constant 0 : index
    %c0_21 = arith.constant 0 : index
    %59 = vector.load %arg3[%c1_19, %c0_20, %c0_21] : memref<3x8x16xbf16, #tpu.memory_space<vmem>>, vector<1x8x16xbf16>
    %60 = vector.shape_cast %59 : vector<1x8x16xbf16> to vector<8x16xbf16>
    %cst_22 = arith.constant dense<0.000000e+00> : vector<32x16xf32>
    %61 = tpu.matmul %58, %60, %cst_22 {dimension_numbers = #tpu.dot_dimension_numbers<[1], [0], [0], [1], [0, 0, 1, 1], [], []>} : vector<32x8xbf16>, vector<8x16xbf16>, vector<32x16xf32> -> vector<32x16xf32>
    %62 = arith.addf %57, %61 : vector<32x16xf32>
    %63 = arith.truncf %50 : vector<32x8xf32> to vector<32x8xbf16>
    %c2_23 = arith.constant 2 : index
    %c0_24 = arith.constant 0 : index
    %c0_25 = arith.constant 0 : index
    %64 = vector.load %arg3[%c2_23, %c0_24, %c0_25] : memref<3x8x16xbf16, #tpu.memory_space<vmem>>, vector<1x8x16xbf16>
    %65 = vector.shape_cast %64 : vector<1x8x16xbf16> to vector<8x16xbf16>
    %cst_26 = arith.constant dense<0.000000e+00> : vector<32x16xf32>
    %66 = tpu.matmul %63, %65, %cst_26 {dimension_numbers = #tpu.dot_dimension_numbers<[1], [0], [0], [1], [0, 0, 1, 1], [], []>} : vector<32x8xbf16>, vector<8x16xbf16>, vector<32x16xf32> -> vector<32x16xf32>
    %67 = arith.addf %62, %66 : vector<32x16xf32>
    %c0_27 = arith.constant 0 : index
    %c0_28 = arith.constant 0 : index
    %68 = vector.load %arg4[%c0_27, %c0_28] : memref<1x16xf32, #tpu.memory_space<vmem>>, vector<1x16xf32>
    %69 = vector.broadcast %68 : vector<1x16xf32> to vector<32x16xf32>
    %70 = arith.addf %67, %69 : vector<32x16xf32>
    %cst_29 = arith.constant 0.000000e+00 : f32
    %71 = vector.broadcast %cst_29 : f32 to vector<32x16xf32>
    %72 = arith.maximumf %70, %71 : vector<32x16xf32>
    %73 = vector.extract_strided_slice %72 {offsets = [0, 0], sizes = [8, 16], strides = [1, 1]} : vector<32x16xf32> to vector<8x16xf32>
    %74 = vector.extract_strided_slice %72 {offsets = [16, 0], sizes = [8, 16], strides = [1, 1]} : vector<32x16xf32> to vector<8x16xf32>
    %75 = tpu.concatenate %73, %74 in 0 : vector<8x16xf32>, vector<8x16xf32> -> vector<16x16xf32>
    %76 = vector.extract_strided_slice %72 {offsets = [8, 0], sizes = [8, 16], strides = [1, 1]} : vector<32x16xf32> to vector<8x16xf32>
    %77 = vector.extract_strided_slice %72 {offsets = [24, 0], sizes = [8, 16], strides = [1, 1]} : vector<32x16xf32> to vector<8x16xf32>
    %78 = tpu.concatenate %76, %77 in 0 : vector<8x16xf32>, vector<8x16xf32> -> vector<16x16xf32>
    %cst_30 = arith.constant 0.000000e+00 : f32
    %79 = vector.broadcast %cst_30 : f32 to vector<8x16xf32>
    %80 = vector.extract_strided_slice %78 {offsets = [0, 0], sizes = [8, 16], strides = [1, 1]} : vector<16x16xf32> to vector<8x16xf32>
    %81 = tpu.concatenate %79, %80 in 0 : vector<8x16xf32>, vector<8x16xf32> -> vector<16x16xf32>
    %82 = arith.truncf %81 : vector<16x16xf32> to vector<16x16xbf16>
    %c0_31 = arith.constant 0 : index
    %c0_32 = arith.constant 0 : index
    %c0_33 = arith.constant 0 : index
    %83 = vector.load %arg5[%c0_31, %c0_32, %c0_33] : memref<3x16x32xbf16, #tpu.memory_space<vmem>>, vector<1x16x32xbf16>
    %84 = vector.shape_cast %83 : vector<1x16x32xbf16> to vector<16x32xbf16>
    %cst_34 = arith.constant dense<0.000000e+00> : vector<16x32xf32>
    %85 = tpu.matmul %82, %84, %cst_34 {dimension_numbers = #tpu.dot_dimension_numbers<[1], [0], [0], [1], [0, 0, 1, 1], [], []>} : vector<16x16xbf16>, vector<16x32xbf16>, vector<16x32xf32> -> vector<16x32xf32>
    %86 = arith.truncf %75 : vector<16x16xf32> to vector<16x16xbf16>
    %c1_35 = arith.constant 1 : index
    %c0_36 = arith.constant 0 : index
    %c0_37 = arith.constant 0 : index
    %87 = vector.load %arg5[%c1_35, %c0_36, %c0_37] : memref<3x16x32xbf16, #tpu.memory_space<vmem>>, vector<1x16x32xbf16>
    %88 = vector.shape_cast %87 : vector<1x16x32xbf16> to vector<16x32xbf16>
    %cst_38 = arith.constant dense<0.000000e+00> : vector<16x32xf32>
    %89 = tpu.matmul %86, %88, %cst_38 {dimension_numbers = #tpu.dot_dimension_numbers<[1], [0], [0], [1], [0, 0, 1, 1], [], []>} : vector<16x16xbf16>, vector<16x32xbf16>, vector<16x32xf32> -> vector<16x32xf32>
    %90 = arith.addf %85, %89 : vector<16x32xf32>
    %91 = arith.truncf %78 : vector<16x16xf32> to vector<16x16xbf16>
    %c2_39 = arith.constant 2 : index
    %c0_40 = arith.constant 0 : index
    %c0_41 = arith.constant 0 : index
    %92 = vector.load %arg5[%c2_39, %c0_40, %c0_41] : memref<3x16x32xbf16, #tpu.memory_space<vmem>>, vector<1x16x32xbf16>
    %93 = vector.shape_cast %92 : vector<1x16x32xbf16> to vector<16x32xbf16>
    %cst_42 = arith.constant dense<0.000000e+00> : vector<16x32xf32>
    %94 = tpu.matmul %91, %93, %cst_42 {dimension_numbers = #tpu.dot_dimension_numbers<[1], [0], [0], [1], [0, 0, 1, 1], [], []>} : vector<16x16xbf16>, vector<16x32xbf16>, vector<16x32xf32> -> vector<16x32xf32>
    %95 = arith.addf %90, %94 : vector<16x32xf32>
    %c0_43 = arith.constant 0 : index
    %c0_44 = arith.constant 0 : index
    %96 = vector.load %arg6[%c0_43, %c0_44] : memref<1x32xf32, #tpu.memory_space<vmem>>, vector<1x32xf32>
    %97 = vector.broadcast %96 : vector<1x32xf32> to vector<16x32xf32>
    %98 = arith.addf %95, %97 : vector<16x32xf32>
    %cst_45 = arith.constant 0.000000e+00 : f32
    %99 = vector.broadcast %cst_45 : f32 to vector<16x32xf32>
    %100 = arith.maximumf %98, %99 : vector<16x32xf32>
    %101 = arith.truncf %100 : vector<16x32xf32> to vector<16x32xbf16>
    %c0_46 = arith.constant 0 : index
    %c0_47 = arith.constant 0 : index
    %102 = vector.load %arg7[%c0_46, %c0_47] : memref<32x64xbf16, #tpu.memory_space<vmem>>, vector<32x64xbf16>
    %cst_48 = arith.constant dense<0.000000e+00> : vector<16x64xf32>
    %103 = tpu.matmul %101, %102, %cst_48 {dimension_numbers = #tpu.dot_dimension_numbers<[1], [0], [0], [1], [0, 0, 1, 1], [], []>} : vector<16x32xbf16>, vector<32x64xbf16>, vector<16x64xf32> -> vector<16x64xf32>
    %c0_49 = arith.constant 0 : index
    %c0_50 = arith.constant 0 : index
    %104 = vector.load %arg9[%c0_49, %c0_50] : memref<1x64xf32, #tpu.memory_space<vmem>>, vector<1x64xf32>
    %105 = vector.broadcast %104 : vector<1x64xf32> to vector<16x64xf32>
    %106 = arith.addf %103, %105 : vector<16x64xf32>
    %c0_51 = arith.constant 0 : index
    %c0_52 = arith.constant 0 : index
    %107 = vector.load %arg8[%c0_51, %c0_52] : memref<16x64xbf16, #tpu.memory_space<vmem>>, vector<16x64xbf16>
    %108 = vector.extract_strided_slice %106 {offsets = [0, 0], sizes = [8, 64], strides = [1, 1]} : vector<16x64xf32> to vector<8x64xf32>
    %cst_53 = arith.constant 5.000000e-01 : f32
    %109 = vector.broadcast %cst_53 : f32 to vector<8x64xf32>
    %110 = arith.mulf %109, %108 : vector<8x64xf32>
    %111 = math.tanh %110 : vector<8x64xf32>
    %cst_54 = arith.constant 1.000000e+00 : f32
    %112 = vector.broadcast %cst_54 : f32 to vector<8x64xf32>
    %113 = arith.addf %111, %112 : vector<8x64xf32>
    %cst_55 = arith.constant 5.000000e-01 : f32
    %114 = vector.broadcast %cst_55 : f32 to vector<8x64xf32>
    %115 = arith.mulf %114, %113 : vector<8x64xf32>
    %116 = vector.extract_strided_slice %115 {offsets = [0, 0], sizes = [8, 16], strides = [1, 1]} : vector<8x64xf32> to vector<8x16xf32>
    %117 = vector.extract_strided_slice %108 {offsets = [0, 32], sizes = [8, 16], strides = [1, 1]} : vector<8x64xf32> to vector<8x16xf32>
    %118 = math.tanh %117 : vector<8x16xf32>
    %119 = vector.extract_strided_slice %115 {offsets = [0, 48], sizes = [8, 16], strides = [1, 1]} : vector<8x64xf32> to vector<8x16xf32>
    %120 = arith.mulf %116, %118 : vector<8x16xf32>
    %121 = math.tanh %120 : vector<8x16xf32>
    %122 = arith.mulf %119, %121 : vector<8x16xf32>
    %123 = vector.extract_strided_slice %106 {offsets = [8, 0], sizes = [8, 64], strides = [1, 1]} : vector<16x64xf32> to vector<8x64xf32>
    %124 = arith.truncf %122 : vector<8x16xf32> to vector<8x16xbf16>
    %cst_56 = arith.constant dense<0.000000e+00> : vector<8x64xf32>
    %125 = tpu.matmul %124, %107, %cst_56 {dimension_numbers = #tpu.dot_dimension_numbers<[1], [0], [0], [1], [0, 0, 1, 1], [], []>} : vector<8x16xbf16>, vector<16x64xbf16>, vector<8x64xf32> -> vector<8x64xf32>
    %126 = arith.addf %123, %125 : vector<8x64xf32>
    %cst_57 = arith.constant 5.000000e-01 : f32
    %127 = vector.broadcast %cst_57 : f32 to vector<8x64xf32>
    %128 = arith.mulf %127, %126 : vector<8x64xf32>
    %129 = math.tanh %128 : vector<8x64xf32>
    %cst_58 = arith.constant 1.000000e+00 : f32
    %130 = vector.broadcast %cst_58 : f32 to vector<8x64xf32>
    %131 = arith.addf %129, %130 : vector<8x64xf32>
    %cst_59 = arith.constant 5.000000e-01 : f32
    %132 = vector.broadcast %cst_59 : f32 to vector<8x64xf32>
    %133 = arith.mulf %132, %131 : vector<8x64xf32>
    %134 = vector.extract_strided_slice %133 {offsets = [0, 0], sizes = [8, 16], strides = [1, 1]} : vector<8x64xf32> to vector<8x16xf32>
    %135 = vector.extract_strided_slice %133 {offsets = [0, 16], sizes = [8, 16], strides = [1, 1]} : vector<8x64xf32> to vector<8x16xf32>
    %136 = vector.extract_strided_slice %126 {offsets = [0, 32], sizes = [8, 16], strides = [1, 1]} : vector<8x64xf32> to vector<8x16xf32>
    %137 = math.tanh %136 : vector<8x16xf32>
    %138 = vector.extract_strided_slice %133 {offsets = [0, 48], sizes = [8, 16], strides = [1, 1]} : vector<8x64xf32> to vector<8x16xf32>
    %139 = arith.mulf %135, %120 : vector<8x16xf32>
    %140 = arith.mulf %134, %137 : vector<8x16xf32>
    %141 = arith.addf %139, %140 : vector<8x16xf32>
    %142 = math.tanh %141 : vector<8x16xf32>
    %143 = arith.mulf %138, %142 : vector<8x16xf32>
    %144 = arith.maximumf %122, %143 : vector<8x16xf32>
    %145 = arith.truncf %144 : vector<8x16xf32> to vector<8x16xbf16>
    %c0_60 = arith.constant 0 : index
    %c0_61 = arith.constant 0 : index
    %146 = vector.load %arg10[%c0_60, %c0_61] : memref<16x128xbf16, #tpu.memory_space<vmem>>, vector<16x128xbf16>
    %cst_62 = arith.constant dense<0.000000e+00> : vector<8x128xf32>
    %147 = tpu.matmul %145, %146, %cst_62 {dimension_numbers = #tpu.dot_dimension_numbers<[1], [0], [0], [1], [0, 0, 1, 1], [], []>} : vector<8x16xbf16>, vector<16x128xbf16>, vector<8x128xf32> -> vector<8x128xf32>
    %c0_63 = arith.constant 0 : index
    %c0_64 = arith.constant 0 : index
    %148 = vector.load %arg11[%c0_63, %c0_64] : memref<1x128xf32, #tpu.memory_space<vmem>>, vector<1x128xf32>
    %149 = vector.broadcast %148 : vector<1x128xf32> to vector<8x128xf32>
    %150 = arith.addf %147, %149 : vector<8x128xf32>
    %c0_65 = arith.constant 0 : index
    %c0_66 = arith.constant 0 : index
    %151 = vector.load %arg12[%c0_65, %c0_66] : memref<8x128xf32, #tpu.memory_space<vmem>>, vector<8x128xf32>
    tpu.vector_store %arg12[%c0_65, %c0_66], %150 {strides = array<i32>} : memref<8x128xf32, #tpu.memory_space<vmem>>, vector<8x128xf32>,
    return
  }
}

</mosaic_0001>

<bundles_post_ra>
// kernel: cnn_lstm_forward.1
= control target key start
LH: loop header
LB: loop body
LE: loop exit
PB: predicated region body
PF: predicated region fallthrough
CT: control target
= control target key end

     0   :  { %vm82_vm0 = vcmask 1041408   ;;  %vm69_vm1 = vcmask 31744   ;;  %v679_v10 = vmov 0.0   ;;  %vm251_vm2 = vcmask 1043456   ;;  %s681_s20 = smov 16   ;;  %s682_s21 = smov 48   ;;  %s888_s1 = inlined_call_operand.vmem [shape: bf16[3,4,8], index: 1, kind: input, shape index: {}]   ;;  %s889_s0 = inlined_call_operand.vmem [shape: f32[128,4], index: 0, kind: input, shape index: {}]   ;;  %s890_s2 = inlined_call_operand.vmem [shape: f32[1,8], index: 2, kind: input, shape index: {}]   ;;  %s891_s3 = inlined_call_operand.vmem [shape: bf16[3,8,16], index: 3, kind: input, shape index: {}]   ;;  %s892_s4 = inlined_call_operand.vmem [shape: f32[1,16], index: 4, kind: input, shape index: {}]   ;;  %s893_s5 = inlined_call_operand.vmem [shape: bf16[3,16,32], index: 5, kind: input, shape index: {}]   ;;  %s894_s6 = inlined_call_operand.vmem [shape: f32[1,32], index: 6, kind: input, shape index: {}]   ;;  %s895_s9 = inlined_call_operand.vmem [shape: f32[1,64], index: 9, kind: input, shape index: {}]   ;;  %s896_s7 = inlined_call_operand.vmem [shape: bf16[32,64], index: 7, kind: input, shape index: {}]   ;;  %s897_s8 = inlined_call_operand.vmem [shape: bf16[16,64], index: 8, kind: input, shape index: {}]   ;;  %s898_s10 = inlined_call_operand.vmem [shape: bf16[16,128], index: 10, kind: input, shape index: {}]   ;;  %s899_s11 = inlined_call_operand.vmem [shape: f32[1,128], index: 11, kind: input, shape index: {}]   ;;  %s900_s12 = inlined_call_operand.vmem [shape: f32[8,128], index: 12, kind: output, shape index: {}]  }
   0x1   :  { %v589_v0 = vld [vmem:[%s888_s1 + $0x2] sm:$0x3]  ;;  %v62_v1 = vld [vmem:[%s888_s1] sm:$0x3]  ;;  %v598_v2 = vld [vmem:[%s888_s1 + $0x4] sm:$0x3] }
   0x2   :  { %v84_v3 = vsel %vm82_vm0, %v589_v0, 0  ;;  %v128_v4 = vsel %vm82_vm0, %v62_v1, 0  ;;  %v178_v5 = vsel %vm82_vm0, %v598_v2, 0  ;;  %v42_v6 = vld [vmem:[%s889_s0] sm:$0xff]  ;;  %v44_v7 = vld [vmem:[%s889_s0 + $0x10] sm:$0xff]  ;;  %v43_v8 = vld [vmem:[%s889_s0 + $0x8] sm:$0xff] }
   0x3   :  { %93 = vmatpush.bf16.msra.mxu0 %v84_v3  ;;  %137 = vmatpush.bf16.msra.mxu1 %v128_v4  ;;  %v63_v9 = vpack.c.bf16 %v44_v7, %v42_v6  ;;  %v58_v11 = vpack.c.bf16 %v43_v8, %v679_v10  ;;  %v45_v12 = vld [vmem:[%s889_s0 + $0x18] sm:$0xff]  ;;  %v46_v14 = vld [vmem:[%s889_s0 + $0x20] sm:$0xff]  ;;  %v48_v15 = vld [vmem:[%s889_s0 + $0x30] sm:$0xff]  ;;  %vm244_vm3 = vcmask 64512   ;;  %vm363_vm4 = vcmask 130048   ;;  %s683_s23 = smov 80  }
   0x4   :  { %187 = vmatpush.bf16.msra.mxu2 %v178_v5  ;;  %v159_v13 = vpack.c.bf16 %v45_v12, %v43_v8  ;;  %v47_v16 = vld [vmem:[%s889_s0 + $0x28] sm:$0xff]  ;;  %v49_v17 = vld [vmem:[%s889_s0 + $0x38] sm:$0xff]  ;;  %v64_v18 = vpack.c.bf16 %v48_v15, %v46_v14  ;;  %v50_v21 = vld [vmem:[%s889_s0 + $0x40] sm:$0xff]  ;;  %vm462_vm5 = vcmask 261120  }
   0x5   :  { %v59_v19 = vpack.c.bf16 %v47_v16, %v45_v12  ;;  %v160_v20 = vpack.c.bf16 %v49_v17, %v47_v16  ;;  %v52_v22 = vld [vmem:[%s889_s0 + $0x50] sm:$0xff]  ;;  %v51_v23 = vld [vmem:[%s889_s0 + $0x48] sm:$0xff]  ;;  %v53_v24 = vld [vmem:[%s889_s0 + $0x58] sm:$0xff] }
   0x6   :  { %590 = vmatmul.msk.bf16.vlgmr.msra.gmra.mxu0 %vm69_vm1, %v63_v9  ;;  %594 = vmatmul.msk.bf16.vlgmr.msra.gmra.mxu1 %vm69_vm1, %v58_v11  ;;  %v65_v25 = vpack.c.bf16 %v52_v22, %v50_v21  ;;  %v60_v26 = vpack.c.bf16 %v51_v23, %v49_v17  ;;  %v161_v27 = vpack.c.bf16 %v53_v24, %v51_v23  ;;  %v54_v28 = vld [vmem:[%s889_s0 + $0x60] sm:$0xff]  ;;  %v56_v29 = vld [vmem:[%s889_s0 + $0x70] sm:$0xff]  ;;  %v55_v30 = vld [vmem:[%s889_s0 + $0x68] sm:$0xff] }
   0x7   :  { %599 = vmatmul.msk.bf16.vlgmr.msra.gmra.mxu2 %vm69_vm1, %v159_v13  ;;  %v57_v31 = vld [vmem:[%s889_s0 + $0x78] sm:$0xff]  ;;  %v66_v32 = vpack.c.bf16 %v56_v29, %v54_v28  ;;  %v61_v33 = vpack.c.bf16 %v55_v30, %v53_v24  ;;  %v603_v35 = vld [vmem:[%s891_s3 + $0x4] sm:$0xf]  ;;  %v608_v36 = vld [vmem:[%s891_s3 + $0x8] sm:$0xf] }
   0x8   :  { %v162_v34 = vpack.c.bf16 %v57_v31, %v55_v30  ;;  %v253_v37 = vsel %vm251_vm2, %v603_v35, 0  ;;  %v313_v38 = vsel %vm251_vm2, %v608_v36, 0  ;;  %v662_v49 = vld [vmem:[%s890_s2] ss:$0 sm:$0xff] }
   0x9   :  { %262 = vmatpush.bf16.msra.mxu3 %v253_v37  ;;  %322 = vmatpush.bf16.msrb.mxu0 %v313_v38  ;;  %v239_v51 = vld [vmem:[%s891_s3] sm:$0xf] }
   0xa   :  { %v281_v52 = vsel %vm251_vm2, %v239_v51, 0 }
   0xd   :  { %290 = vmatpush.bf16.msrb.mxu3 %v281_v52 }
  0x16   :  { %591 = vmatmul.msk.bf16.gmra.mxu0 %vm69_vm1, %v64_v18  ;;  %595 = vmatmul.msk.bf16.gmra.mxu1 %vm69_vm1, %v59_v19 }
  0x17   :  { %600 = vmatmul.msk.bf16.gmra.mxu2 %vm69_vm1, %v160_v20 }
  0x26   :  { %592 = vmatmul.msk.bf16.gmra.mxu0 %vm69_vm1, %v65_v25  ;;  %596 = vmatmul.msk.bf16.gmra.mxu1 %vm69_vm1, %v60_v26 }
  0x27   :  { %601 = vmatmul.msk.bf16.gmra.mxu2 %vm69_vm1, %v161_v27 }
  0x36   :  { %593 = vmatmul.msk.bf16.gmra.mxu0 %vm69_vm1, %v66_v32  ;;  %597 = vmatmul.msk.bf16.gmra.mxu1 %vm69_vm1, %v61_v33 }
  0x37   :  { %602 = vmatmul.msk.bf16.gmra.mxu2 %vm69_vm1, %v162_v34 }
  0x83   :  { %v95_v39 = vpop.f32.mrf.mxu0  ;;  %v139_v40 = vpop.f32.mrf.mxu1 }
  0x84   :  { %v140_v45 = vadd.f32 %v139_v40, %v95_v39 }
  0x8a   :  { %v189_v41 = vpop.f32.mrf.mxu2 }
  0x8b   :  { %v97_v42 = vpop.f32.mrf.mxu0  ;;  %v141_v43 = vpop.f32.mrf.mxu1  ;;  %v209_v48 = vadd.f32 %v189_v41, %v140_v45  ;;  %v649_v41 = vld [vmem:[%s893_s5] sm:$0xff] }
  0x8c   :  { %v142_v58 = vadd.f32 %v141_v43, %v97_v42  ;;  %v650_v42 = vld [vmem:[%s893_s5 + $0x8] sm:$0xff]  ;;  %397 = vmatpush.bf16.msrb.mxu2 %v649_v41  ;;  %v654_v41 = vld [vmem:[%s897_s8] sm:$0xff]  ;;  %s684_s8 = smov 32  }
  0x8d   :  { %v221_v54 = vadd.f32 %v662_v49, %v209_v48  ;;  %374 = vmatpush.bf16.msrb.mxu1 %v650_v42 }
  0x8f   :  { %v229_v60 = vmax.f32 %v221_v54, 0.0  ;;  %v663_v54 = vld [vmem:[%s892_s4] ss:$0 sm:$0xff] }
  0x90   :  { %518 = vmatpush.bf16.msra.mxu2 %v654_v41 }
  0x92   :  { %v191_v44 = vpop.f32.mrf.mxu2 }
  0x93   :  { %v100_v46 = vpop.f32.mrf.mxu0  ;;  %v144_v47 = vpop.f32.mrf.mxu1  ;;  %v210_v61 = vadd.f32 %v191_v44, %v142_v58  ;;  %v651_v44 = vld [vmem:[%s893_s5 + $0x10] sm:$0xff] }
  0x94   :  { %v145_v50 = vadd.f32 %v144_v47, %v100_v46 }
  0x95   :  { %v222_v2 = vadd.f32 %v662_v49, %v210_v61 }
  0x97   :  { %v230_v7 = vmax.f32 %v222_v2, 0.0 }
  0x99   :  { %v237_v39 = vpack.c.bf16 %v230_v7, %v679_v10 }
  0x9a   :  { %v194_v53 = vpop.f32.mrf.mxu2 }
  0x9b   :  { %v211_v55 = vadd.f32 %v194_v53, %v145_v50  ;;  %v102_v56 = vpop.f32.mrf.mxu0  ;;  %v146_v57 = vpop.f32.mrf.mxu1 }
  0x9c   :  { %v147_v63 = vadd.f32 %v146_v57, %v102_v56 }
  0x9d   :  { %v223_v59 = vadd.f32 %v662_v49, %v211_v55 }
  0x9f   :  { %v231_v62 = vmax.f32 %v223_v59, 0.0 }
  0xa1   :  { %v240_v0 = vpack.c.bf16 %v231_v62, %v229_v60 }
  0xa2   :  { %v196_v1 = vpop.f32.mrf.mxu2 }
  0xa3   :  { %v212_v3 = vadd.f32 %v196_v1, %v147_v63  ;;  %604 = vmatmul.msk.bf16.vlgmr.msra.gmra.mxu3 %vm244_vm3, %v240_v0  ;;  %v105_v4 = vpop.f32.mrf.mxu0  ;;  %v149_v5 = vpop.f32.mrf.mxu1 }
  0xa4   :  { %v150_v15 = vadd.f32 %v149_v5, %v105_v4  ;;  %424 = vmatpush.bf16.msra.mxu3 %v651_v44 }
  0xa5   :  { %v224_v6 = vadd.f32 %v662_v49, %v212_v3 }
  0xa7   :  { %v232_v8 = vmax.f32 %v224_v6, 0.0 }
  0xa9   :  { %v302_v9 = vpack.c.bf16 %v232_v8, %v230_v7 }
  0xaa   :  { %v199_v11 = vpop.f32.mrf.mxu2 }
  0xab   :  { %609 = vmatmul.msk.bf16.vlgmr.msrb.gmra.mxu0 %vm244_vm3, %v302_v9  ;;  %v107_v12 = vpop.f32.mrf.mxu0  ;;  %v151_v13 = vpop.f32.mrf.mxu1  ;;  %v213_v18 = vadd.f32 %v199_v11, %v150_v15 }
  0xac   :  { %v152_v23 = vadd.f32 %v151_v13, %v107_v12  ;;  %v652_v13 = vld [vmem:[%s896_s7] sm:$0xff] }
  0xad   :  { %v225_v21 = vadd.f32 %v662_v49, %v213_v18 }
  0xaf   :  { %v233_v27 = vmax.f32 %v225_v21, 0.0 }
  0xb2   :  { %v201_v14 = vpop.f32.mrf.mxu2 }
  0xb3   :  { %v110_v16 = vpop.f32.mrf.mxu0  ;;  %v154_v17 = vpop.f32.mrf.mxu1  ;;  %v214_v28 = vadd.f32 %v201_v14, %v152_v23 }
  0xb4   :  { %v155_v19 = vadd.f32 %v154_v17, %v110_v16 }
  0xb5   :  { %v226_v33 = vadd.f32 %v662_v49, %v214_v28 }
  0xb7   :  { %v234_v36 = vmax.f32 %v226_v33, 0.0 }
  0xb9   :  { %v238_v40 = vpack.c.bf16 %v234_v36, %v232_v8 }
  0xba   :  { %v204_v20 = vpop.f32.mrf.mxu2 }
  0xbb   :  { %v215_v22 = vadd.f32 %v204_v20, %v155_v19  ;;  %v112_v25 = vpop.f32.mrf.mxu0  ;;  %v156_v26 = vpop.f32.mrf.mxu1  ;;  %v664_v20 = vld [vmem:[%s894_s6] ss:$0 sm:$0xff]  ;;  %s680_s6 = smov 96  }
  0xbc   :  { %v157_v30 = vadd.f32 %v156_v26, %v112_v25 }
  0xbd   :  { %v227_v24 = vadd.f32 %v662_v49, %v215_v22 }
  0xbf   :  { %v235_v29 = vmax.f32 %v227_v24, 0.0 }
  0xc1   :  { %v241_v31 = vpack.c.bf16 %v235_v29, %v233_v27 }
  0xc2   :  { %v206_v32 = vpop.f32.mrf.mxu2 }
  0xc3   :  { %v216_v34 = vadd.f32 %v206_v32, %v157_v30  ;;  %605 = vmatmul.msk.bf16.gmra.mxu3 %vm244_vm3, %v241_v31  ;;  %v665_v30 = vld [vmem:[%s895_s9] ss:$0 sm:$0xff] }
  0xc5   :  { %v228_v35 = vadd.f32 %v662_v49, %v216_v34 }
  0xc7   :  { %v236_v37 = vmax.f32 %v228_v35, 0.0 }
  0xc9   :  { %v303_v38 = vpack.c.bf16 %v236_v37, %v234_v36 }
  0xcb   :  { %610 = vmatmul.msk.bf16.gmra.mxu0 %vm244_vm3, %v303_v38 }
  0xd3   :  { %606 = vmatmul.msk.bf16.vlgmr.msrb.gmra.mxu3 %vm244_vm3, %v237_v39 }
  0xe3   :  { %607 = vmatmul.msk.bf16.gmra.mxu3 %vm244_vm3, %v238_v40 }
 0x126   :  { %v264_v43 = vpop.f32.mrf.mxu3 }
 0x128   :  { %v324_v48 = vpop.f32.mrf.mxu0 }
 0x12e   :  { %v266_v45 = vpop.f32.mrf.mxu3 }
 0x130   :  { %v326_v50 = vpop.f32.mrf.mxu0 }
 0x146   :  { %v269_v46 = vpop.f32.mrf.mxu3 }
 0x148   :  { %v329_v59 = vpop.f32.mrf.mxu0 }
 0x14e   :  { %v271_v47 = vpop.f32.mrf.mxu3 }
 0x150   :  { %v331_v7 = vpop.f32.mrf.mxu0 }
 0x156   :  { %v292_v49 = vpop.f32.mrf.mxu3 }
 0x157   :  { %v293_v53 = vadd.f32 %v292_v49, %v264_v43 }
 0x159   :  { %v334_v57 = vadd.f32 %v324_v48, %v293_v53 }
 0x15b   :  { %v342_v63 = vadd.f32 %v663_v54, %v334_v57 }
 0x15d   :  { %v346_v2 = vmax.f32 %v342_v63, 0.0  ;;  %v655_v63 = vld [vmem:[%s898_s10] sm:$0xff] }
 0x15e   :  { %v294_v51 = vpop.f32.mrf.mxu3  ;;  %578 = vmatpush.bf16.msrb.mxu3 %v655_v63 }
 0x15f   :  { %v295_v52 = vadd.f32 %v294_v51, %v266_v45 }
 0x161   :  { %v335_v55 = vadd.f32 %v326_v50, %v295_v52 }
 0x163   :  { %v343_v56 = vadd.f32 %v663_v54, %v335_v55 }
 0x165   :  { %v347_v58 = vmax.f32 %v343_v56, 0.0 }
 0x166   :  { %v297_v60 = vpop.f32.mrf.mxu3 }
 0x167   :  { %v350_v61 = vpack.c.bf16 %v347_v58, %v679_v10  ;;  %v298_v62 = vadd.f32 %v297_v60, %v269_v46  ;;  %v653_v10 = vld [vmem:[%s896_s7 + $0x8] sm:$0xff] }
 0x168   :  { %472 = vmatpush.bf16.msra.mxu1 %v653_v10 }
 0x169   :  { %v336_v0 = vadd.f32 %v329_v59, %v298_v62  ;;  %622 = vmatmul.msk.bf16.vlgmr.msrb.gmra.mxu2 %vm363_vm4, %v350_v61 }
 0x16b   :  { %v344_v1 = vadd.f32 %v663_v54, %v336_v0 }
 0x16c   :  { %473 = vmatpush.bf16.msra.mxu1 %v652_v13 }
 0x16d   :  { %v348_v3 = vmax.f32 %v344_v1, 0.0 }
 0x16e   :  { %v299_v4 = vpop.f32.mrf.mxu3 }
 0x16f   :  { %v353_v5 = vpack.c.bf16 %v348_v3, %v346_v2  ;;  %v300_v6 = vadd.f32 %v299_v4, %v271_v47 }
 0x171   :  { %v337_v8 = vadd.f32 %v331_v7, %v300_v6  ;;  %617 = vmatmul.msk.bf16.vlgmr.msrb.gmra.mxu1 %vm363_vm4, %v353_v5  ;;  %v666_v5 = vld [vmem:[%s899_s11] ss:$0 sm:$0xff] }
 0x173   :  { %v345_v9 = vadd.f32 %v663_v54, %v337_v8 }
 0x175   :  { %v349_v11 = vmax.f32 %v345_v9, 0.0 }
 0x177   :  { %v404_v12 = vpack.c.bf16 %v349_v11, %v347_v58 }
 0x179   :  { %629 = vmatmul.msk.bf16.vlgmr.msra.gmra.mxu3 %vm363_vm4, %v404_v12 }
 0x1ec   :  { %v399_v15 = vpop.f32.mrf.mxu2 }
 0x1ee   :  { %v376_v14 = vpop.f32.mrf.mxu1 }
 0x1ef   :  { %v400_v17 = vadd.f32 %v399_v15, %v376_v14 }
 0x1f4   :  { %v401_v21 = vpop.f32.mrf.mxu2 }
 0x1f6   :  { %v378_v18 = vpop.f32.mrf.mxu1 }
 0x1f7   :  { %v402_v22 = vadd.f32 %v401_v21, %v378_v18 }
 0x1fc   :  { %v426_v16 = vpop.f32.mrf.mxu3 }
 0x1fd   :  { %v431_v19 = vadd.f32 %v426_v16, %v400_v17 }
 0x1ff   :  { %v437_v24 = vadd.f32 %v664_v20, %v431_v19 }
 0x201   :  { %v439_v27 = vmax.f32 %v437_v24, 0.0 }
 0x204   :  { %v428_v23 = vpop.f32.mrf.mxu3 }
 0x205   :  { %v432_v25 = vadd.f32 %v428_v23, %v402_v22 }
 0x207   :  { %v438_v26 = vadd.f32 %v664_v20, %v432_v25 }
 0x209   :  { %v440_v28 = vmax.f32 %v438_v26, 0.0 }
 0x20b   :  { %v441_v29 = vpack.c.bf16 %v440_v28, %v439_v27 }
 0x20d   :  { %638 = vmatmul.msk.bf16.vlgmr.msra.gmra.mxu1 %vm462_vm5, %v441_v29 }
 0x28a   :  { %v475_v31 = vpop.f32.mrf.mxu1 }
 0x28b   :  { %v476_v32 = vadd.f32 %v665_v30, %v475_v31 }
 0x28d   :  { %667 = vtanh.f32 %v476_v32  ;;  %v482_v34 = vmul.f32 0.5, %v476_v32 }
 0x28f   :  { %669 = vtanh.f32 %v482_v34 }
 0x292   :  { %v477_v46 = vpop.f32.mrf.mxu1 }
 0x293   :  { %v668_v33 = vpop.eup %667  ;;  %v478_v47 = vadd.f32 %v665_v30, %v477_v46 }
 0x294   :  { %488 = vrot.lane.b32.xlu0 %v668_v33, %s680_s6 }
 0x295   :  { %v670_v35 = vpop.eup %669 }
 0x296   :  { %v484_v36 = vadd.f32 1.0, %v670_v35 }
 0x298   :  { %v485_v37 = vmul.f32 0.5, %v484_v36 }
 0x306   :  { %v489_v38 = vpop.permute.xlu0 %488 }
 0x307   :  { %v491_v39 = vmul.f32 %v489_v38, %v485_v37 }
 0x309   :  { %671 = vtanh.f32 %v491_v39  ;;  %531 = vrot.lane.b32.xlu2 %v491_v39, %s681_s20 }
 0x30f   :  { %v672_v40 = vpop.eup %671 }
 0x310   :  { %494 = vrot.lane.b32.xlu0 %v672_v40, %s682_s21 }
 0x363   :  { %v532_v58 = vpop.permute.xlu2 %531 }
 0x382   :  { %v495_v42 = vpop.permute.xlu0 %494 }
 0x383   :  { %v497_v43 = vmul.f32 %v495_v42, %v485_v37 }
 0x385   :  { %v498_v44 = vpack.c.bf16 %v497_v43, %v497_v43 }
 0x387   :  { %500 = vrot.lane.b32.xlu1 %v498_v44, %s683_s23 }
 0x3f9   :  { %v501_v45 = vpop.permute.xlu1 %500 }
 0x3fa   :  { %643 = vmatmul.msk.bf16.vlgmr.msra.gmra.mxu2 %vm363_vm4, %v501_v45 }
 0x47d   :  { %v520_v48 = vpop.f32.mrf.mxu2 }
 0x47e   :  { %v524_v49 = vadd.f32 %v520_v48, %v478_v47 }
 0x480   :  { %673 = vtanh.f32 %v524_v49  ;;  %v525_v52 = vmul.f32 0.5, %v524_v49 }
 0x482   :  { %675 = vtanh.f32 %v525_v52 }
 0x485   :  { %v522_v50 = vpop.f32.mrf.mxu2 }
 0x486   :  { %v674_v51 = vpop.eup %673 }
 0x487   :  { %536 = vrot.lane.b32.xlu1 %v674_v51, %s680_s6 }
 0x488   :  { %v676_v53 = vpop.eup %675 }
 0x489   :  { %v527_v54 = vadd.f32 1.0, %v676_v53 }
 0x48b   :  { %v528_v55 = vmul.f32 0.5, %v527_v54 }
 0x48d   :  { %v534_v59 = vmul.f32 %v532_v58, %v528_v55 }
 0x4f9   :  { %v537_v56 = vpop.permute.xlu1 %536 }
 0x4fa   :  { %v539_v57 = vmul.f32 %v537_v56, %v528_v55 }
 0x4fc   :  { %541 = vrot.lane.b32.xlu2 %v539_v57, %s681_s20 }
 0x556   :  { %v542_v60 = vpop.permute.xlu2 %541 }
 0x557   :  { %v544_v61 = vadd.f32 %v542_v60, %v534_v59 }
 0x559   :  { %677 = vtanh.f32 %v544_v61 }
 0x55f   :  { %v678_v62 = vpop.eup %677 }
 0x560   :  { %547 = vrot.lane.b32.xlu0 %v678_v62, %s684_s8 }
 0x5d2   :  { %v548_v0 = vpop.permute.xlu0 %547 }
 0x5d3   :  { %v550_v1 = vmul.f32 %v548_v0, %v528_v55 }
 0x5d5   :  { %v551_v2 = vmax.f32 %v497_v43, %v550_v1 }
 0x5d7   :  { %v552_v3 = vpack.c.bf16 %v551_v2, %v551_v2 }
 0x5d9   :  { %560 = vrot.lane.b32.xlu1 %v552_v3, %s683_s23 }
 0x64b   :  { %v561_v4 = vpop.permute.xlu1 %560 }
 0x64c   :  { %648 = vmatmul.msk.bf16.vlgmr.msrb.gmra.mxu3 %vm363_vm4, %v561_v4 }
 0x6cf   :  { %v580_v6 = vpop.f32.mrf.mxu3 }
 0x6d0   :  { %v581_v7 = vadd.f32 %v666_v5, %v580_v6 }
 0x6d2   :  { %584 = vst [vmem:[%s900_s12] sm:$0xff] %v581_v7 }
 0x6d7   :  { %v582_v8 = vpop.f32.mrf.mxu3 }

</bundles_post_ra>
